<compile_context>
chip_gen: v5e
topology: v5e:2x2
jax: 0.10.0
libtpu: 0.0.40
codegen_flags: <defaults>
</compile_context>

<pallas_src>
import jax
import jax.numpy as jnp
from jax.experimental import pallas as pl
from jax.experimental.pallas import tpu as pltpu

_OUT_PAD = 128  # lane-dense padded output width (real logits live in [:, :2])


def _nsp_kernel(x_ref, w1_ref, b1_ref, w2p_ref, b2p_ref, out_ref):
    # Hidden layer on the MXU: (TB, F_in) @ (F_in, H) with f32 accumulation.
    h = jnp.dot(x_ref[...], w1_ref[...], preferred_element_type=jnp.float32)
    # Bias + tanh in f32 (VPU/EUP).
    h = jnp.tanh(h + b1_ref[...])
    # Logits on the MXU against the 128-column padded W2 -> lane-dense store.
    logits = jnp.dot(h.astype(w2p_ref.dtype), w2p_ref[...],
                     preferred_element_type=jnp.float32)
    out_ref[...] = (logits + b2p_ref[...]).astype(out_ref.dtype)


def next_sentence_pred(x, w1, b1, w2, b2, *, tb=1024,
                       compute_dtype=jnp.bfloat16):
    """Forward pass of NextSentencePred.

    x : (B, F_in)   w1: (F_in, H)   b1: (1, H)   w2: (H, 2)   b2: (1, 2)
    returns (B, 2) float32 logits.
    """
    B, f_in = x.shape
    H = w1.shape[1]
    n_out = w2.shape[1]  # 2

    # Lane-dense weight/bias padding for the second Linear (done once in XLA).
    w2p = jnp.zeros((H, _OUT_PAD), dtype=compute_dtype)
    w2p = w2p.at[:, :n_out].set(w2.astype(compute_dtype))
    b2p = jnp.zeros((1, _OUT_PAD), dtype=jnp.float32)
    b2p = b2p.at[:, :n_out].set(b2.astype(jnp.float32))

    xc = x.astype(compute_dtype)
    w1c = w1.astype(compute_dtype)
    b1f = b1.astype(jnp.float32).reshape(1, H)

    # Batch tile: large enough to amortize the ~0.35 us per-grid-step overhead,
    # trivially within VMEM on all generations (well under v7x's 32 MiB scoped
    # default even double-buffered), and never larger than B itself.
    tb = min(tb, B)
    grid = (pl.cdiv(B, tb),)

    out_padded = pl.pallas_call(
        _nsp_kernel,
        out_shape=jax.ShapeDtypeStruct((B, _OUT_PAD), jnp.float32),
        grid=grid,
        in_specs=[
            pl.BlockSpec((tb, f_in), lambda i: (i, 0)),      # streamed per tile
            pl.BlockSpec((f_in, H), lambda i: (0, 0)),       # resident weights
            pl.BlockSpec((1, H), lambda i: (0, 0)),
            pl.BlockSpec((H, _OUT_PAD), lambda i: (0, 0)),
            pl.BlockSpec((1, _OUT_PAD), lambda i: (0, 0)),
        ],
        out_specs=pl.BlockSpec((tb, _OUT_PAD), lambda i: (i, 0)),
        compiler_params=pltpu.CompilerParams(
            dimension_semantics=("parallel",)),
    )(xc, w1c, b1f, w2p, b2p)

    # Cheap XLA slice back to the 2 real classes.
    return out_padded[:, :n_out]


if __name__ == "__main__":
    # Small but tiling-exercising shapes: batch=256, nsp_in_features=128,
    # nsp_hiddens=128, 2 output classes.  tb=128 -> grid of 2 batch tiles.
    B, F_IN, H = 256, 128, 128

    key = jax.random.PRNGKey(0)
    kx, kw1, kb1, kw2, kb2 = jax.random.split(key, 5)

    x = jax.random.normal(kx, (B, F_IN), dtype=jnp.float32)
    w1 = jax.random.normal(kw1, (F_IN, H), dtype=jnp.float32) * (1.0 / F_IN ** 0.5)
    b1 = jax.random.normal(kb1, (1, H), dtype=jnp.float32) * 0.01
    w2 = jax.random.normal(kw2, (H, 2), dtype=jnp.float32) * (1.0 / H ** 0.5)
    b2 = jax.random.normal(kb2, (1, 2), dtype=jnp.float32) * 0.01

    out = next_sentence_pred(x, w1, b1, w2, b2, tb=128)
    jax.block_until_ready(out)
    assert out.shape == (B, 2)

    # Reference with the same bf16 parameter/activation rounding the kernel
    # applies, math in f32 (matches the kernel's accumulation dtype).
    xb = x.astype(jnp.bfloat16).astype(jnp.float32)
    w1b = w1.astype(jnp.bfloat16).astype(jnp.float32)
    w2b = w2.astype(jnp.bfloat16).astype(jnp.float32)
    h_ref = jnp.tanh(xb @ w1b + b1)
    h_ref = h_ref.astype(jnp.bfloat16).astype(jnp.float32)
    ref = h_ref @ w2b + b2
    assert jnp.allclose(out, ref, atol=2e-3, rtol=2e-3)

    # Loose sanity check against the pure-f32 PyTorch-equivalent math.
    ref_f32 = jnp.tanh(x @ w1 + b1) @ w2 + b2
    assert jnp.allclose(out, ref_f32, atol=5e-2, rtol=5e-2)

    print("KERNEL_OK")
</pallas_src>

<mosaic_0001>
module attributes {stable_mosaic.version = 11 : i64} {
  func.func @_nsp_kernel(%arg0: i32, %arg1: memref<128x128xbf16, #tpu.memory_space<vmem>>, %arg2: memref<128x128xbf16, #tpu.memory_space<vmem>>, %arg3: memref<1x128xf32, #tpu.memory_space<vmem>>, %arg4: memref<128x128xbf16, #tpu.memory_space<vmem>>, %arg5: memref<1x128xf32, #tpu.memory_space<vmem>>, %arg6: memref<128x128xf32, #tpu.memory_space<vmem>>) attributes {dimension_semantics = [#tpu.dimension_semantics<parallel>], iteration_bounds = array<i64: 2>, scalar_prefetch = 0 : i64, scratch_operands = 0 : i64, tpu.core_type = #tpu.core_type<tc>, window_params = [{transform_indices = @transform_0, window_bounds = array<i64: 128, 128>}, {pipeline_mode = #tpu.pipeline_mode<synchronous>, transform_indices = @transform_1, window_bounds = array<i64: 128, 128>}, {pipeline_mode = #tpu.pipeline_mode<synchronous>, transform_indices = @transform_2, window_bounds = array<i64: 1, 128>}, {pipeline_mode = #tpu.pipeline_mode<synchronous>, transform_indices = @transform_3, window_bounds = array<i64: 128, 128>}, {pipeline_mode = #tpu.pipeline_mode<synchronous>, transform_indices = @transform_4, window_bounds = array<i64: 1, 128>}, {transform_indices = @transform_5, window_bounds = array<i64: 128, 128>}]} {
    %c0 = arith.constant 0 : index
    %c0_0 = arith.constant 0 : index
    %0 = vector.load %arg1[%c0, %c0_0] : memref<128x128xbf16, #tpu.memory_space<vmem>>, vector<128x128xbf16>
    %c0_1 = arith.constant 0 : index
    %c0_2 = arith.constant 0 : index
    %1 = vector.load %arg2[%c0_1, %c0_2] : memref<128x128xbf16, #tpu.memory_space<vmem>>, vector<128x128xbf16>
    %cst = arith.constant dense<0.000000e+00> : vector<128x128xf32>
    %2 = tpu.matmul %0, %1, %cst {dimension_numbers = #tpu.dot_dimension_numbers<[1], [0], [0], [1], [0, 0, 1, 1], [], []>} : vector<128x128xbf16>, vector<128x128xbf16>, vector<128x128xf32> -> vector<128x128xf32>
    %c0_3 = arith.constant 0 : index
    %c0_4 = arith.constant 0 : index
    %3 = vector.load %arg3[%c0_3, %c0_4] : memref<1x128xf32, #tpu.memory_space<vmem>>, vector<1x128xf32>
    %4 = vector.broadcast %3 : vector<1x128xf32> to vector<128x128xf32>
    %5 = arith.addf %2, %4 : vector<128x128xf32>
    %6 = math.tanh %5 : vector<128x128xf32>
    %7 = arith.truncf %6 : vector<128x128xf32> to vector<128x128xbf16>
    %c0_5 = arith.constant 0 : index
    %c0_6 = arith.constant 0 : index
    %8 = vector.load %arg4[%c0_5, %c0_6] : memref<128x128xbf16, #tpu.memory_space<vmem>>, vector<128x128xbf16>
    %cst_7 = arith.constant dense<0.000000e+00> : vector<128x128xf32>
    %9 = tpu.matmul %7, %8, %cst_7 {dimension_numbers = #tpu.dot_dimension_numbers<[1], [0], [0], [1], [0, 0, 1, 1], [], []>} : vector<128x128xbf16>, vector<128x128xbf16>, vector<128x128xf32> -> vector<128x128xf32>
    %c0_8 = arith.constant 0 : index
    %c0_9 = arith.constant 0 : index
    %10 = vector.load %arg5[%c0_8, %c0_9] : memref<1x128xf32, #tpu.memory_space<vmem>>, vector<1x128xf32>
    %11 = vector.broadcast %10 : vector<1x128xf32> to vector<128x128xf32>
    %12 = arith.addf %9, %11 : vector<128x128xf32>
    %c0_10 = arith.constant 0 : index
    %c0_11 = arith.constant 0 : index
    %13 = vector.load %arg6[%c0_10, %c0_11] : memref<128x128xf32, #tpu.memory_space<vmem>>, vector<128x128xf32>
    tpu.vector_store %arg6[%c0_10, %c0_11], %12 {strides = array<i32>} : memref<128x128xf32, #tpu.memory_space<vmem>>, vector<128x128xf32>,
    return
  }
  func.func @transform_0(%arg0: i32) -> (i32, i32) {
    %c0_i32 = arith.constant 0 : i32
    %c0_i32_0 = arith.constant 0 : i32
    return %arg0, %c0_i32 : i32, i32
  }
  func.func @transform_1(%arg0: i32) -> (i32, i32) {
    %c0_i32 = arith.constant 0 : i32
    %c0_i32_0 = arith.constant 0 : i32
    %c0_i32_1 = arith.constant 0 : i32
    return %c0_i32, %c0_i32_0 : i32, i32
  }
  func.func @transform_2(%arg0: i32) -> (i32, i32) {
    %c0_i32 = arith.constant 0 : i32
    %c0_i32_0 = arith.constant 0 : i32
    %c0_i32_1 = arith.constant 0 : i32
    return %c0_i32, %c0_i32_0 : i32, i32
  }
  func.func @transform_3(%arg0: i32) -> (i32, i32) {
    %c0_i32 = arith.constant 0 : i32
    %c0_i32_0 = arith.constant 0 : i32
    %c0_i32_1 = arith.constant 0 : i32
    return %c0_i32, %c0_i32_0 : i32, i32
  }
  func.func @transform_4(%arg0: i32) -> (i32, i32) {
    %c0_i32 = arith.constant 0 : i32
    %c0_i32_0 = arith.constant 0 : i32
    %c0_i32_1 = arith.constant 0 : i32
    return %c0_i32, %c0_i32_0 : i32, i32
  }
  func.func @transform_5(%arg0: i32) -> (i32, i32) {
    %c0_i32 = arith.constant 0 : i32
    %c0_i32_0 = arith.constant 0 : i32
    return %arg0, %c0_i32 : i32, i32
  }
}

</mosaic_0001>

<bundles_post_ra>
// kernel: tpu_custom_call.1
= control target key start
LH: loop header
LB: loop body
LE: loop exit
PB: predicated region body
PF: predicated region fallthrough
CT: control target
= control target key end

     0   :  { %10 = vsyncpa [#allocation3], 0  ;;  %s1389_s0 = inlined_call_operand.hbm [shape: bf16[256,128], index: 0, kind: input, shape index: {}]   ;;  %s1390_s1 = inlined_call_operand.hbm [shape: bf16[128,128], index: 1, kind: input, shape index: {}]   ;;  %s1391_s2 = inlined_call_operand.vmem [shape: f32[1,128], index: 2, kind: input, shape index: {}]   ;;  %s1392_s3 = inlined_call_operand.hbm [shape: bf16[128,128], index: 3, kind: input, shape index: {}]   ;;  %s1393_s4 = inlined_call_operand.vmem [shape: f32[1,128], index: 4, kind: input, shape index: {}]   ;;  %s1394_s5 = inlined_call_operand.hbm [shape: f32[256,128], index: 5, kind: output, shape index: {}]  }
   0x1   :  { %12 = vsyncpa [#allocation3 + $0x1], 0 }
   0x2   :  { %13 = vsyncpa [#allocation6], 0 }
   0x3   :  { %14 = vsyncpa [#allocation4], 0 }
   0x4   :  { %16 = vsyncpa [#allocation4 + $0x1], 0  ;;  %s1185_s18 = smov 0   ;;  %s1187_s19 = smov 0  }
   0x5   :  { %s1189_s20 = smov 0   ;;  %s1191_s21 = smov 0  }
   0x6 LB: > { %s1206_s22 = sadd.s32 4294967295, %s1147_s21   ;;  %s726_s23 = sadd.s32 4294967294, %s1147_s21   ;;  %s1147_s21 = sphi %s1191_s21, %s1406_s21   ;;  %s1143_s20 = sphi %s1189_s20, %s1405_s20   ;;  %s1139_s19 = sphi %s1187_s19, %s1404_s19   ;;  %s1135_s18 = sphi %s1185_s18, %s1403_s18  }
   0x7   : > { %p42_p0 = scmp.ne.s32.totalorder %s1139_s19, %s1135_s18  ;;  %p43_p1 = scmp.eq.s32.totalorder %s1206_s22, 0 }
   0x8   : > { %p150_p2 = scmp.eq.s32.totalorder %s1206_s22, 1  ;;  %p156_p3 = scmp.eq.s32.totalorder %s726_s23, 1 }
   0x9   : > { %p1215_p4 = por %p43_p1, %p42_p0  ;;  %p727_p5 = scmp.ge.s32.totalorder %s1147_s21, 1 }
   0xa   : > { %p1220_p6 = por %p156_p3, %p42_p0  ;;  %p163_p7 = scmp.lt.s32.totalorder %s1147_s21, 3 }
   0xb   : > { %s174_s28 = sshll.u32 %s1390_s1, 4  ;;  %s1149_s30 = smov [#allocation5]   ;;  %s175_s28 = int_to_ptr.hbm [resolvable:$true] %s174_s28 }
   0xc   : > { %p1228_p8 = pnand %p727_p5, %p163_p7  ;;  %s176_s6 = sshll.u32 %s1149_s30, 4  ;;  %s177_s6 = int_to_ptr.vmem [resolvable:$true] %s176_s6 }
   0xd   : > { %s191_s9 = sshll.u32 %s1392_s3, 4  ;;  %s1395_s10 = smov 64   ;;  %s192_s9 = int_to_ptr.hbm [resolvable:$true] %s191_s9 }
   0xe   : > { %p894_p9 = pneg %p1228_p8  ;;  %s1151_s11 = smov 4  }
   0xf   : > { %s1152_s12 = smov [#allocation7]   ;;  %s1247_s14 = sadd.s32 1, %s1147_s21  }
  0x10   : > { %p895_p10 = pnand %p894_p9, %p43_p1  ;;  %s193_s13 = sshll.u32 %s1152_s12, 4  ;;  %s194_s13 = int_to_ptr.vmem [resolvable:$true] %s193_s13 }
  0x11   : > { %s29_s15 = sadd.s32 1, %s1143_s20  ;;  %s26_s16 = ssub.s32 %s1147_s21, %s1247_s14 }
  0x12   : > { %897 = dma.hbm_to_vmem [thread:$0]  (!%p895_p10), %s175_s28, 1024, %s177_s6, [#allocation6], %s1395_s10, %s1395_s10, %s1151_s11  }
  0x13   : > { %900 = dma.hbm_to_vmem [thread:$0]  (!%p895_p10), %s192_s9, 1024, %s194_s13, [#allocation6], %s1395_s10, %s1395_s10, %s1151_s11  }
  0x14   : > { %p36_p12 = scmp.ne.s32.totalorder %s1143_s20, %s1139_s19  ;;  %p27_p13 = scmp.eq.s32.totalorder %s26_s16, 0 }
  0x15   : > { %p37_p0 = scmp.eq.s32.totalorder %s1147_s21, 0  ;;  %p911_p5 = scmp.lt.s32.totalorder %s1147_s21, 2 }
  0x16   : > { %p1257_p3 = por %p150_p2, %p36_p12  ;;  %s210_s26 = sand.u32 1, %s1143_s20  }
  0x17   : > { %s1263_s23 = scalar_select %p27_p13, %s1143_s20, %s29_s15  }
  0x18   : > { %p38_p7 = por %p37_p0, %p36_p12  ;;  %s731_s27 = sshll.u32 %s210_s26, 6 }
  0x19   : > { %s840_s28 = sshll.u32 %s1147_s21, 6  ;;  %s214_s8 = scalar_lea.vmem [#allocation2], %s731_s27 }
  0x1a   : > { %s219_s7 = scalar_lea.hbm %s1389_s0, %s840_s28  ;;  %s222_s9 = sshll.u32 %s214_s8, 4  ;;  %s223_s9 = int_to_ptr.vmem [resolvable:$true] %s222_s9 }
  0x1b   : > { %s220_s12 = sshll.u32 %s219_s7, 4  ;;  %p1270_p2 = pnand %p911_p5, %p38_p7  ;;  %s221_s12 = int_to_ptr.hbm [resolvable:$true] %s220_s12 }
  0x1c   : > { %s211_s15 = scalar_lea.sflag [#allocation3], %s210_s26  ;;  %s1047_s16 = sshra.s32 %s221_s12, 4  ;;  %s1048_s16 = int_to_ptr.hbm [resolvable:$true] %s1047_s16 }
  0x1d   : > { %s1049_s10 = scalar_lea.hbm %s1048_s16, 64  ;;  %p1051_p10 = pneg %p1270_p2 }
  0x1e   : > { %p1050_p9 = scmp.ne.s32.totalorder %s1048_s16, %s1049_s10  ;;  %s1054_s30 = scalar_lea.hbm %s1389_s0, 128 }
  0x1f   : > { %p1055_p0 = scmp.lt.s32.totalorder %s1048_s16, %s1389_s0  ;;  %p1056_p5 = scmp.lt.s32.totalorder %s1054_s30, %s1049_s10 }
  0x20   : > { %p1052_p12 = pnand %p1051_p10, %p1050_p9 }
  0x21   : > { %p1057_p7 = por %p1056_p5, %p1055_p0 }
  0x22   : > { %p1053_p13 = pneg %p1052_p12 }
  0x24   : > { %p1058_p11 = pnand %p1057_p7, %p1053_p13 }
  0x26   : > { %1061 = shalt.err (!%p1058_p11)
}
  0x27   : > { %s1401_s26 = smov 64   ;;  %234 = sbr.rel (%p1228_p8) target bundleno = 424 (0x1a8), region = 40 }
  0x28   : > { %904 = dma.hbm_to_vmem [thread:$0]  (!%p1270_p2), %s221_s12, 1024, %s223_s9, %s211_s15, %s1401_s26, %s1401_s26, %s1151_s11  }
  0x29   : > { %s1290_s8 = sand.u32 (!%p1228_p8), 1, %s1139_s19  }
  0x2a   : > { %s735_s16 = sshll.u32 (!%p1228_p8), %s1290_s8, 6  ;;  %s237_s10 = scalar_lea.sflag (!%p1228_p8), [#allocation3], %s1290_s8 }
  0x2b   : > { %s1294_s28 = scalar_lea.vmem (!%p1228_p8), [#allocation2], %s735_s16 }
  0x2c   : > { %1122 = dma.done.wait (%p1215_p4), %s237_s10, 1024  }
  0x2d   : > { %1124 = vsyncadd (%p1215_p4), %s237_s10, 4294966272 }
  0x2e   : > { %1126 = dma.done.wait (%p43_p1), [#allocation6], 2048  }
  0x2f   : > { %1128 = vsyncadd (%p43_p1), [#allocation6], 4294965248  ;;  %v856_v0 = vld [vmem:[#allocation5 + $0x38] sm:$0xff]  ;;  %v855_v1 = vld [vmem:[#allocation5 + $0x30] sm:$0xff]  ;;  %s738_s11 = sshll.u32 %s1290_s8, 7  ;;  %s865_s15 = sshll.u32 %s1206_s22, 7 }
  0x30   : > { %412 = vmatpush.bf16.msra.mxu0 %v856_v0  ;;  %866 = vmatpush.bf16.msra.mxu2 %v856_v0  ;;  %v854_v2 = vld [vmem:[#allocation5 + $0x28] sm:$0xff]  ;;  %v853_v3 = vld [vmem:[#allocation5 + $0x20] sm:$0xff]  ;;  %v852_v4 = vld [vmem:[#allocation5 + $0x18] sm:$0xff]  ;;  %s1337_s13 = scalar_lea.vmem [#allocation8], %s738_s11  ;;  %s630_s6 = scalar_lea.hbm %s1394_s5, %s865_s15 }
  0x31   : > { %v851_v5 = vld [vmem:[#allocation5 + $0x10] sm:$0xff]  ;;  %v850_v6 = vld [vmem:[#allocation5 + $0x8] sm:$0xff]  ;;  %v849_v7 = vld [vmem:[#allocation5] sm:$0xff]  ;;  %s631_s7 = sshll.u32 %s1337_s13, 4  ;;  %s633_s26 = sshll.u32 %s630_s6, 4  ;;  %s632_s7 = int_to_ptr.vmem [resolvable:$true] %s631_s7  ;;  %s634_s26 = int_to_ptr.hbm [resolvable:$true] %s633_s26 }
  0x32   : > { %v841_v8 = vld [vmem:[%s1294_s28] sm:$0xff]  ;;  %v842_v10 = vld [vmem:[%s1294_s28 + $0x8] sm:$0xff]  ;;  %v864_v12 = vld [vmem:[#allocation7 + $0x38] sm:$0xff]  ;;  %s619_s16 = scalar_lea.sflag [#allocation4], %s1290_s8  ;;  %s1091_s10 = sshra.s32 %s634_s26, 4  ;;  %s1092_s10 = int_to_ptr.hbm [resolvable:$true] %s1091_s10 }
  0x33   : > { %v845_v9 = vld [vmem:[%s1294_s28 + $0x20] sm:$0xff]  ;;  %v846_v11 = vld [vmem:[%s1294_s28 + $0x28] sm:$0xff]  ;;  %553 = vmatpush.bf16.msra.mxu1 %v864_v12  ;;  %v863_v13 = vld [vmem:[#allocation7 + $0x30] sm:$0xff]  ;;  %874 = vmatpush.bf16.msra.mxu3 %v864_v12  ;;  %s1097_s29 = scalar_lea.hbm %s1394_s5, 256  ;;  %p1098_p11 = scmp.lt.s32.totalorder %s1092_s10, %s1394_s5 }
  0x34   : > { %413 = vmatpush.bf16.msra.mxu0 %v855_v1  ;;  %867 = vmatpush.bf16.msra.mxu2 %v855_v1  ;;  %v862_v14 = vld [vmem:[#allocation7 + $0x28] sm:$0xff]  ;;  %v843_v15 = vld [vmem:[%s1294_s28 + $0x10] sm:$0xff]  ;;  %v844_v17 = vld [vmem:[%s1294_s28 + $0x18] sm:$0xff] }
  0x35   : > { %v847_v16 = vld [vmem:[%s1294_s28 + $0x30] sm:$0xff]  ;;  %v848_v18 = vld [vmem:[%s1294_s28 + $0x38] sm:$0xff]  ;;  %v861_v19 = vld [vmem:[#allocation7 + $0x20] sm:$0xff]  ;;  %s1093_s28 = scalar_lea.hbm %s1092_s10, 128 }
  0x36   : > { %v860_v20 = vld [vmem:[#allocation7 + $0x18] sm:$0xff]  ;;  %v859_v21 = vld [vmem:[#allocation7 + $0x10] sm:$0xff]  ;;  %v858_v22 = vld [vmem:[#allocation7 + $0x8] sm:$0xff]  ;;  %p1094_p1 = scmp.ne.s32.totalorder %s1092_s10, %s1093_s28  ;;  %p1099_p2 = scmp.lt.s32.totalorder %s1097_s29, %s1093_s28 }
  0x37   : > { %554 = vmatpush.bf16.msra.mxu1 %v863_v13  ;;  %875 = vmatpush.bf16.msra.mxu3 %v863_v13  ;;  %v857_v23 = vld [vmem:[#allocation7] sm:$0xff] }
  0x38   : > { %414 = vmatpush.bf16.msra.mxu0 %v854_v2  ;;  %868 = vmatpush.bf16.msra.mxu2 %v854_v2  ;;  %v1315_v25 = vld [vmem:[%s1391_s2] ss:$0 sm:$0xff]  ;;  %p1095_p4 = pnand %p1094_p1, %p1257_p3  ;;  %p1100_p9 = por %p1099_p2, %p1098_p11 }
  0x3a   : > { %p1096_p8 = pneg %p1095_p4 }
  0x3b   : > { %555 = vmatpush.bf16.msra.mxu1 %v862_v14  ;;  %876 = vmatpush.bf16.msra.mxu3 %v862_v14 }
  0x3c   : > { %415 = vmatpush.bf16.msra.mxu0 %v853_v3  ;;  %869 = vmatpush.bf16.msra.mxu2 %v853_v3  ;;  %p1101_p10 = pnand %p1100_p9, %p1096_p8 }
  0x3f   : > { %556 = vmatpush.bf16.msra.mxu1 %v861_v19  ;;  %877 = vmatpush.bf16.msra.mxu3 %v861_v19 }
  0x40   : > { %416 = vmatpush.bf16.msra.mxu0 %v852_v4  ;;  %870 = vmatpush.bf16.msra.mxu2 %v852_v4 }
  0x43   : > { %557 = vmatpush.bf16.msra.mxu1 %v860_v20  ;;  %878 = vmatpush.bf16.msra.mxu3 %v860_v20 }
  0x44   : > { %417 = vmatpush.bf16.msra.mxu0 %v851_v5  ;;  %871 = vmatpush.bf16.msra.mxu2 %v851_v5 }
  0x47   : > { %558 = vmatpush.bf16.msra.mxu1 %v859_v21  ;;  %879 = vmatpush.bf16.msra.mxu3 %v859_v21 }
  0x48   : > { %418 = vmatpush.bf16.msra.mxu0 %v850_v6  ;;  %872 = vmatpush.bf16.msra.mxu2 %v850_v6 }
  0x4b   : > { %559 = vmatpush.bf16.msra.mxu1 %v858_v22  ;;  %880 = vmatpush.bf16.msra.mxu3 %v858_v22 }
  0x4c   : > { %419 = vmatpush.bf16.msra.mxu0 %v849_v7  ;;  %873 = vmatpush.bf16.msra.mxu2 %v849_v7 }
  0x4f   : > { %420 = vmatmul.bf16.vlgmr.msra.gmra.mxu0 %v841_v8  ;;  %440 = vmatmul.bf16.vlgmr.msra.gmra.mxu2 %v845_v9 }
  0x50   : > { %560 = vmatpush.bf16.msra.mxu1 %v857_v23  ;;  %881 = vmatpush.bf16.msra.mxu3 %v857_v23 }
  0x5f   : > { %425 = vmatmul.bf16.gmra.mxu0 %v842_v10  ;;  %445 = vmatmul.bf16.gmra.mxu2 %v846_v11 }
  0x6f   : > { %430 = vmatmul.bf16.gmra.mxu0 %v843_v15  ;;  %450 = vmatmul.bf16.gmra.mxu2 %v847_v16 }
  0x7f   : > { %435 = vmatmul.bf16.gmra.mxu0 %v844_v17  ;;  %455 = vmatmul.bf16.gmra.mxu2 %v848_v18  ;;  %v954_v17 = vld [vmem:[%s1393_s4] ss:$0 sm:$0xff] }
  0xcc   : > { %v421_v24 = vpop.f32.mrf.mxu0 }
  0xcd   : > { %v422_v26 = vadd.f32 %v1315_v25, %v421_v24 }
  0xcf   : > { %955 = vtanh.f32 %v422_v26 }
  0xd2   : > { %v441_v27 = vpop.f32.mrf.mxu2 }
  0xd3   : > { %v442_v30 = vadd.f32 %v1315_v25, %v441_v27 }
  0xd4   : > { %v423_v28 = vpop.f32.mrf.mxu0 }
  0xd5   : > { %v424_v29 = vadd.f32 %v1315_v25, %v423_v28  ;;  %v956_v32 = vpop.eup %955 }
  0xd7   : > { %957 = vtanh.f32 %v424_v29 }
  0xd8   : > { %959 = vtanh.f32 %v442_v30 }
  0xda   : > { %v443_v31 = vpop.f32.mrf.mxu2 }
  0xdb   : > { %v444_v33 = vadd.f32 %v1315_v25, %v443_v31 }
  0xdc   : > { %v426_v34 = vpop.f32.mrf.mxu0 }
  0xdd   : > { %v958_v35 = vpop.eup %957  ;;  %961 = vtanh.f32 %v444_v33  ;;  %v427_v37 = vadd.f32 %v1315_v25, %v426_v34 }
  0xde   : > { %v477_v36 = vpack.c.bf16 %v958_v35, %v956_v32  ;;  %v960_v38 = vpop.eup %959 }
  0xdf   : > { %963 = vtanh.f32 %v427_v37 }
  0xe0   : > { %561 = vmatmul.bf16.vlgmr.msra.gmra.mxu1 %v477_v36 }
  0xe2   : > { %v446_v39 = vpop.f32.mrf.mxu2 }
  0xe3   : > { %v962_v40 = vpop.eup %961  ;;  %v447_v44 = vadd.f32 %v1315_v25, %v446_v39 }
  0xe4   : > { %v428_v41 = vpop.f32.mrf.mxu0  ;;  %v481_v42 = vpack.c.bf16 %v962_v40, %v960_v38 }
  0xe5   : > { %v429_v43 = vadd.f32 %v1315_v25, %v428_v41  ;;  %v964_v46 = vpop.eup %963 }
  0xe6   : > { %581 = vmatmul.bf16.vlgmr.msra.gmra.mxu3 %v481_v42 }
  0xe7   : > { %965 = vtanh.f32 %v429_v43 }
  0xe8   : > { %967 = vtanh.f32 %v447_v44 }
  0xea   : > { %v448_v45 = vpop.f32.mrf.mxu2 }
  0xeb   : > { %v449_v47 = vadd.f32 %v1315_v25, %v448_v45 }
  0xec   : > { %v431_v48 = vpop.f32.mrf.mxu0 }
  0xed   : > { %v966_v49 = vpop.eup %965  ;;  %969 = vtanh.f32 %v449_v47  ;;  %v432_v51 = vadd.f32 %v1315_v25, %v431_v48 }
  0xee   : > { %v478_v50 = vpack.c.bf16 %v966_v49, %v964_v46  ;;  %v968_v52 = vpop.eup %967 }
  0xef   : > { %971 = vtanh.f32 %v432_v51 }
  0xf0   : > { %566 = vmatmul.bf16.gmra.mxu1 %v478_v50 }
  0xf2   : > { %v451_v53 = vpop.f32.mrf.mxu2 }
  0xf3   : > { %v970_v54 = vpop.eup %969  ;;  %v452_v58 = vadd.f32 %v1315_v25, %v451_v53 }
  0xf4   : > { %v433_v55 = vpop.f32.mrf.mxu0  ;;  %v482_v56 = vpack.c.bf16 %v970_v54, %v968_v52 }
  0xf5   : > { %v434_v57 = vadd.f32 %v1315_v25, %v433_v55  ;;  %v972_v60 = vpop.eup %971 }
  0xf6   : > { %586 = vmatmul.bf16.gmra.mxu3 %v482_v56 }
  0xf7   : > { %973 = vtanh.f32 %v434_v57 }
  0xf8   : > { %975 = vtanh.f32 %v452_v58 }
  0xfa   : > { %v453_v59 = vpop.f32.mrf.mxu2 }
  0xfb   : > { %v454_v61 = vadd.f32 %v1315_v25, %v453_v59 }
  0xfc   : > { %v436_v62 = vpop.f32.mrf.mxu0 }
  0xfd   : > { %v974_v63 = vpop.eup %973  ;;  %977 = vtanh.f32 %v454_v61  ;;  %v437_v1 = vadd.f32 %v1315_v25, %v436_v62 }
  0xfe   : > { %v479_v0 = vpack.c.bf16 %v974_v63, %v972_v60  ;;  %v976_v2 = vpop.eup %975 }
  0xff   : > { %979 = vtanh.f32 %v437_v1 }
 0x100   : > { %571 = vmatmul.bf16.gmra.mxu1 %v479_v0 }
 0x102   : > { %v456_v3 = vpop.f32.mrf.mxu2 }
 0x103   : > { %v978_v4 = vpop.eup %977  ;;  %v457_v8 = vadd.f32 %v1315_v25, %v456_v3 }
 0x104   : > { %v438_v5 = vpop.f32.mrf.mxu0  ;;  %v483_v6 = vpack.c.bf16 %v978_v4, %v976_v2 }
 0x105   : > { %v439_v7 = vadd.f32 %v1315_v25, %v438_v5  ;;  %v980_v10 = vpop.eup %979 }
 0x106   : > { %591 = vmatmul.bf16.gmra.mxu3 %v483_v6 }
 0x107   : > { %981 = vtanh.f32 %v439_v7 }
 0x108   : > { %983 = vtanh.f32 %v457_v8 }
 0x10a   : > { %v458_v9 = vpop.f32.mrf.mxu2 }
 0x10b   : > { %v459_v11 = vadd.f32 %v1315_v25, %v458_v9 }
 0x10d   : > { %v982_v12 = vpop.eup %981  ;;  %985 = vtanh.f32 %v459_v11 }
 0x10e   : > { %v480_v13 = vpack.c.bf16 %v982_v12, %v980_v10  ;;  %v984_v14 = vpop.eup %983 }
 0x110   : > { %576 = vmatmul.bf16.gmra.mxu1 %v480_v13 }
 0x113   : > { %v986_v15 = vpop.eup %985 }
 0x114   : > { %v484_v16 = vpack.c.bf16 %v986_v15, %v984_v14 }
 0x116   : > { %596 = vmatmul.bf16.gmra.mxu3 %v484_v16 }
 0x15d   : > { %v562_v18 = vpop.f32.mrf.mxu1 }
 0x15e   : > { %v563_v19 = vadd.f32 %v954_v17, %v562_v18 }
 0x160   : > { %602 = vst [vmem:[%s1337_s13] sm:$0xff] %v563_v19 }
 0x165   : > { %v564_v20 = vpop.f32.mrf.mxu1 }
 0x166   : > { %v565_v21 = vadd.f32 %v954_v17, %v564_v20 }
 0x168   : > { %603 = vst [vmem:[%s1337_s13 + $0x8] sm:$0xff] %v565_v21 }
 0x169   : > { %v582_v22 = vpop.f32.mrf.mxu3 }
 0x16a   : > { %v583_v23 = vadd.f32 %v954_v17, %v582_v22 }
 0x16c   : > { %610 = vst [vmem:[%s1337_s13 + $0x40] sm:$0xff] %v583_v23 }
 0x16d   : > { %v567_v24 = vpop.f32.mrf.mxu1 }
 0x16e   : > { %v568_v25 = vadd.f32 %v954_v17, %v567_v24 }
 0x170   : > { %604 = vst [vmem:[%s1337_s13 + $0x10] sm:$0xff] %v568_v25 }
 0x171   : > { %v584_v26 = vpop.f32.mrf.mxu3 }
 0x172   : > { %v585_v27 = vadd.f32 %v954_v17, %v584_v26 }
 0x174   : > { %611 = vst [vmem:[%s1337_s13 + $0x48] sm:$0xff] %v585_v27 }
 0x175   : > { %v569_v28 = vpop.f32.mrf.mxu1 }
 0x176   : > { %v570_v29 = vadd.f32 %v954_v17, %v569_v28 }
 0x178   : > { %605 = vst [vmem:[%s1337_s13 + $0x18] sm:$0xff] %v570_v29 }
 0x179   : > { %v587_v30 = vpop.f32.mrf.mxu3 }
 0x17a   : > { %v588_v31 = vadd.f32 %v954_v17, %v587_v30 }
 0x17c   : > { %612 = vst [vmem:[%s1337_s13 + $0x50] sm:$0xff] %v588_v31 }
 0x17d   : > { %v572_v32 = vpop.f32.mrf.mxu1 }
 0x17e   : > { %v573_v33 = vadd.f32 %v954_v17, %v572_v32 }
 0x180   : > { %606 = vst [vmem:[%s1337_s13 + $0x20] sm:$0xff] %v573_v33 }
 0x181   : > { %v589_v34 = vpop.f32.mrf.mxu3 }
 0x182   : > { %v590_v35 = vadd.f32 %v954_v17, %v589_v34 }
 0x184   : > { %613 = vst [vmem:[%s1337_s13 + $0x58] sm:$0xff] %v590_v35 }
 0x185   : > { %v574_v36 = vpop.f32.mrf.mxu1 }
 0x186   : > { %v575_v37 = vadd.f32 %v954_v17, %v574_v36 }
 0x188   : > { %607 = vst [vmem:[%s1337_s13 + $0x28] sm:$0xff] %v575_v37 }
 0x189   : > { %v592_v38 = vpop.f32.mrf.mxu3 }
 0x18a   : > { %v593_v39 = vadd.f32 %v954_v17, %v592_v38 }
 0x18c   : > { %614 = vst [vmem:[%s1337_s13 + $0x60] sm:$0xff] %v593_v39 }
 0x18d   : > { %v577_v40 = vpop.f32.mrf.mxu1 }
 0x18e   : > { %v578_v41 = vadd.f32 %v954_v17, %v577_v40 }
 0x190   : > { %608 = vst [vmem:[%s1337_s13 + $0x30] sm:$0xff] %v578_v41 }
 0x191   : > { %v594_v42 = vpop.f32.mrf.mxu3 }
 0x192   : > { %v595_v43 = vadd.f32 %v954_v17, %v594_v42 }
 0x194   : > { %615 = vst [vmem:[%s1337_s13 + $0x68] sm:$0xff] %v595_v43 }
 0x195   : > { %v579_v44 = vpop.f32.mrf.mxu1 }
 0x196   : > { %v580_v45 = vadd.f32 %v954_v17, %v579_v44 }
 0x198   : > { %609 = vst [vmem:[%s1337_s13 + $0x38] sm:$0xff] %v580_v45 }
 0x199   : > { %v597_v46 = vpop.f32.mrf.mxu3 }
 0x19a   : > { %v598_v47 = vadd.f32 %v954_v17, %v597_v46 }
 0x19c   : > { %616 = vst [vmem:[%s1337_s13 + $0x70] sm:$0xff] %v598_v47 }
 0x1a1   : > { %v599_v48 = vpop.f32.mrf.mxu3 }
 0x1a2   : > { %v600_v49 = vadd.f32 %v954_v17, %v599_v48 }
 0x1a4   : > { %617 = vst [vmem:[%s1337_s13 + $0x78] sm:$0xff] %v600_v49 }
 0x1a5   : > { %1104 = shalt.err (!%p1101_p10)
}
 0x1a6   : > { %s1153_s8 = smov 128   ;;  %s1154_s12 = smov 8  }
 0x1a7   : > { %892 = dma.vmem_to_hbm [thread:$0]  (%p1257_p3), %s632_s7, 2048, %s634_s26, %s619_s16, %s1153_s8, %s1153_s8, %s1154_s12  }
 0x1a8 PF: > { %s648_s13 = sand.u32 1, %s1135_s18   ;;  %p1402_p12 = scmp.ge.s32.totalorder %s1147_s21, 2 }
 0x1a9   : > { %s649_s15 = scalar_lea.sflag [#allocation4], %s648_s13 }
 0x1aa   : > { %p906_p13 = pnand %p1402_p12, %p1220_p6 }
 0x1ac   : > { %p907_p0 = pneg %p906_p13 }
 0x1ae   : > { %1130 = dma.done.wait (%p907_p0), %s649_s15, 2048  }
 0x1af   : > { %1132 = vsyncadd (%p907_p0), %s649_s15, 4294965248  ;;  %p19_p5 = scmp.ge.s32.totalorder %s1247_s14, 4   ;;  %s1403_s18 = smov %s1139_s19 }
 0x1b0   : > { %s1404_s19 = smov %s1143_s20  ;;  %s1405_s20 = smov %s1263_s23 }
 0x1b1   : > { %s1406_s21 = smov %s1247_s14  ;;  %21 = sbr.rel (!%p19_p5) target bundleno = 6 (0x6), region = 93 }
 0x1b6   :  { %655 = vsyncpa [#allocation3], 1 }
 0x1b7   :  { %657 = vsyncpa [#allocation3 + $0x1], 1 }
 0x1b8   :  { %658 = vsyncpa [#allocation6], 1 }
 0x1b9   :  { %659 = vsyncpa [#allocation4], 1 }
 0x1ba   :  { %661 = vsyncpa [#allocation4 + $0x1], 1 }

</bundles_post_ra>
